<compile_context>
chip_gen: v6e
topology: v6e:2x2x1
jax: 0.10.0
libtpu: 0.0.40
codegen_flags: <defaults>
</compile_context>

<pallas_src>
import functools

import jax
import jax.numpy as jnp
from jax.experimental import pallas as pl
from jax.experimental.pallas import tpu as pltpu

SLOPE = 0.2
LN_EPS = 1e-5


def _leaky(x, slope):
    return jnp.where(x >= 0, x, slope * x)


def _layernorm(x, gamma, beta):
    # PyTorch LayerNorm over last dim, biased variance, eps=1e-5; rsqrt -> EUP.
    mean = jnp.mean(x, axis=-1, keepdims=True)
    var = jnp.mean((x - mean) ** 2, axis=-1, keepdims=True)
    return (x - mean) * jax.lax.rsqrt(var + LN_EPS) * gamma + beta


# -----------------------------------------------------------------------------
# Fused kernel: grid = (batch_blocks, nlayers).  The activation of one batch
# block lives in the o_ref VMEM block (index_map constant in the layer axis) for
# the whole layer sweep; HBM sees the (B,S,C) activation once in / once out.
# -----------------------------------------------------------------------------
def _fused_mixer_kernel(x_ref, win_ref, bin_ref,
                        w1a_ref, w1b_ref, w2a_ref, w2b_ref,
                        vecs_ref, b1_ref,
                        o_ref, *, slope, tb, seq, cdim, in_dim):
    layer = pl.program_id(1)
    m = tb * seq

    # ---- in_net: Linear(input_dim, channel_dim) + LeakyReLU (first layer step) --
    @pl.when(layer == 0)
    def _():
        xm = x_ref[...].reshape(m, in_dim)                     # fold batch into M
        win = win_ref[...]                                     # (D, C) pre-transposed
        y = jnp.dot(xm.astype(win.dtype), win,
                    preferred_element_type=jnp.float32) + bin_ref[...]
        o_ref[...] = _leaky(y, slope).reshape(tb, seq, cdim)

    a = o_ref[...]                                             # (tb, S, C) f32, resident

    # ---- packed per-layer vectors ------------------------------------------------
    vecs = vecs_ref[0]                                         # (6, C) f32
    g1, be1 = vecs[0:1], vecs[1:2]
    g2, be2 = vecs[2:3], vecs[3:4]
    b2a, b2b = vecs[4:5], vecs[5:6]
    b1 = b1_ref[0]                                             # (S, 2) f32
    b1a, b1b = b1[:, 0:1], b1[:, 1:2]                          # (S, 1) column biases

    # ---- token-mixing branch: one wide left-multiply dot, no transposes ----------
    xn = _layernorm(a, g1, be1)                                # (tb, S, C) f32
    w1a = w1a_ref[0]                                           # (S, S)
    w1b = w1b_ref[0]
    # lane-concatenate the tb (S, C) slices -> (S, tb*C); 128-aligned, no data move.
    xn_w = jnp.concatenate([xn[b] for b in range(tb)], axis=-1)
    h = _leaky(jnp.dot(w1a, xn_w.astype(w1a.dtype),
                       preferred_element_type=jnp.float32) + b1a, slope)
    t_w = jnp.dot(w1b, h.astype(w1b.dtype),
                  preferred_element_type=jnp.float32) + b1b     # (S, tb*C)
    # split back into (tb, S, C) and add residual; everything stays in registers.
    x2 = jnp.stack([t_w[:, b * cdim:(b + 1) * cdim] for b in range(tb)], axis=0) + a

    # ---- channel-mixing branch: batch*seq folded into the matmul M dim -----------
    xn2 = _layernorm(x2, g2, be2).reshape(m, cdim)
    w2a = w2a_ref[0]                                           # (C, C) = W2a^T
    w2b = w2b_ref[0]
    h2 = _leaky(jnp.dot(xn2.astype(w2a.dtype), w2a,
                        preferred_element_type=jnp.float32) + b2a, slope)
    y2 = jnp.dot(h2.astype(w2b.dtype), w2b,
                 preferred_element_type=jnp.float32) + b2b      # (m, C)

    # single store per layer step; HBM writeback happens only when the batch-block
    # index changes (out index_map is constant in the layer axis).
    o_ref[...] = y2.reshape(tb, seq, cdim) + x2


def _vmem_capacity_bytes():
    try:
        info = pltpu.get_tpu_info()
        cap = getattr(info, "vmem_capacity_bytes", None)
        if cap:
            return int(cap)
    except Exception:
        pass
    return 64 * 1024 * 1024   # conservative fallback (v7x per-TC size; safe everywhere)


def _pick_batch_tile(batch, seq, vmem_need, vmem_budget, max_m=4096):
    """Largest divisor of `batch` whose working set fits the VMEM budget, while
    keeping >= 2 batch blocks (so v7x's two TensorCores both get grid work)."""
    divs = [t for t in range(1, batch + 1) if batch % t == 0]
    allowed = [t for t in divs if batch == 1 or t <= batch // 2] or [1]
    tb = 1
    for t in allowed:
        if t * seq <= max_m and vmem_need(t) <= vmem_budget:
            tb = max(tb, t)
    return tb


def mlp_mixer_forward(x, params, slope=SLOPE, batch_tile=None, use_bf16_matmul=True):
    """x: (B, S, input_dim) -> (B, S, channel_dim).  Eval mode (dropout = identity)."""
    B, S, D = x.shape
    C = params["w_in"].shape[0]
    layers = params["layers"]
    L = len(layers)
    assert L >= 1, "fused kernel expects at least one mixer layer"

    wdt = jnp.bfloat16 if use_bf16_matmul else jnp.float32
    wbytes = 2 if use_bf16_matmul else 4

    vmem_budget = int(0.85 * _vmem_capacity_bytes())

    layer_w_bytes = (2 * S * S + 2 * C * C) * wbytes + (6 * C + 2 * S) * 4

    def vmem_need(tb):
        return (2 * tb * S * C * 4                  # out block (resident acc), 2x buffered
                + 2 * tb * S * D * 4                # x block, 2x buffered
                + 2 * layer_w_bytes                 # per-layer weights, 2x buffered
                + 2 * (D * C * wbytes + C * 4)      # in_net weights (resident)
                + 6 * tb * S * C * 4                # in-kernel f32 temporaries
                + (4 << 20))                        # headroom

    if batch_tile is None:
        tb = _pick_batch_tile(B, S, vmem_need, vmem_budget)
    else:
        tb = max(t for t in range(1, min(B, batch_tile) + 1) if B % t == 0)

    # Host-side layout plumbing (done once): pre-transpose Linear weights to (in, out),
    # stack per-layer params on a leading L axis, pack the 8 small per-layer vectors
    # into two lane-dense arrays, and keep the token-mix biases as (S, 1)-sliceable
    # columns for the left-multiply form.
    w_in_t = jnp.asarray(params["w_in"].T, dtype=wdt)               # (D, C)
    b_in = params["b_in"].astype(jnp.float32)                       # (1, C)

    def stack(name):
        return jnp.stack([p[name] for p in layers], axis=0)

    w1a = stack("w1a").astype(wdt)                                  # (L, S, S)
    w1b = stack("w1b").astype(wdt)
    w2a_t = jnp.swapaxes(stack("w2a"), 1, 2).astype(wdt)            # (L, C, C) = W.T
    w2b_t = jnp.swapaxes(stack("w2b"), 1, 2).astype(wdt)
    vecs = jnp.stack([jnp.concatenate(
        [p["ln1_g"], p["ln1_b"], p["ln2_g"], p["ln2_b"], p["b2a"], p["b2b"]],
        axis=0) for p in layers], axis=0).astype(jnp.float32)       # (L, 6, C)
    b1 = jnp.stack([jnp.concatenate([p["b1a"], p["b1b"]], axis=0).T
                    for p in layers], axis=0).astype(jnp.float32)   # (L, S, 2)

    n_bblk = B // tb
    grid = (n_bblk, L)

    def per_layer(shape):
        return pl.BlockSpec(shape, lambda b, l: (l,) + (0,) * (len(shape) - 1))

    def shared(shape):
        return pl.BlockSpec(shape, lambda b, l: (0,) * len(shape))

    in_specs = [
        pl.BlockSpec((tb, S, D), lambda b, l: (b, 0, 0)),  # x: fetched once per batch block
        shared((D, C)), shared((1, C)),                    # in_net weight / bias (resident)
        per_layer((1, S, S)), per_layer((1, S, S)),        # token-mix W1a / W1b
        per_layer((1, C, C)), per_layer((1, C, C)),        # channel-mix W2a^T / W2b^T
        per_layer((1, 6, C)),                              # packed LN gammas/betas + b2a/b2b
        per_layer((1, S, 2)),                              # packed token-mix biases b1a/b1b
    ]
    # Out block is the resident accumulator: its index_map must stay constant in the
    # layer axis and the layer axis must remain the innermost ("arbitrary") grid axis.
    out_specs = pl.BlockSpec((tb, S, C), lambda b, l: (b, 0, 0))

    # Advisory cost estimate so XLA schedules the fused custom call sensibly.
    flops = 2 * B * S * D * C + L * (4 * B * S * S * C + 4 * B * S * C * C)
    stream_w_bytes = sum(int(a.nbytes) for a in (w1a, w1b, w2a_t, w2b_t, vecs, b1))
    bytes_accessed = (int(x.nbytes) + 4 * B * S * C + int(w_in_t.nbytes)
                      + int(b_in.nbytes) + n_bblk * stream_w_bytes)
    cost = pl.CostEstimate(flops=int(flops), transcendentals=int(2 * L * B * S),
                           bytes_accessed=int(bytes_accessed))

    # Always set the scoped-VMEM limit (v5e default is only ~16 MiB) and never exceed
    # the queried per-chip capacity (v7x has 64 MiB per TensorCore).
    # TODO(synk): if 2x double-buffered (C,C) weight sets alone approach the budget,
    # add a 3rd grid axis tiling the channel mix over output columns instead.
    vmem_limit = int(min(max(vmem_need(tb), 32 * 1024 * 1024), vmem_budget))

    fn = pl.pallas_call(
        functools.partial(_fused_mixer_kernel, slope=slope, tb=tb, seq=S,
                          cdim=C, in_dim=D),
        out_shape=jax.ShapeDtypeStruct((B, S, C), jnp.float32),
        grid=grid,
        in_specs=in_specs,
        out_specs=out_specs,
        compiler_params=pltpu.CompilerParams(
            dimension_semantics=("parallel", "arbitrary"),
            vmem_limit_bytes=vmem_limit),
        cost_estimate=cost,
    )
    return fn(x, w_in_t, b_in, w1a, w1b, w2a_t, w2b_t, vecs, b1)


# -----------------------------------------------------------------------------
# Parameter initialization (deterministic, mirrors the module's __init__)
# -----------------------------------------------------------------------------
def _kaiming_normal(key, out_dim, in_dim):
    # PyTorch kaiming_normal_ default: fan_in mode, a=0 -> std = sqrt(2/fan_in)
    std = (2.0 / in_dim) ** 0.5
    return jax.random.normal(key, (out_dim, in_dim), dtype=jnp.float32) * std


def init_params(key, input_dim, channel_dim, seq_len, nlayers):
    keys = jax.random.split(key, 2 + 4 * nlayers)
    # in_net Linear: PyTorch default uniform(-1/sqrt(in), 1/sqrt(in))
    bound = 1.0 / (input_dim ** 0.5)
    w_in = jax.random.uniform(keys[0], (channel_dim, input_dim),
                              minval=-bound, maxval=bound, dtype=jnp.float32)
    b_in = jax.random.uniform(keys[1], (1, channel_dim),
                              minval=-bound, maxval=bound, dtype=jnp.float32)
    layers = []
    for i in range(nlayers):
        k0, k1, k2, k3 = keys[2 + 4 * i: 2 + 4 * (i + 1)]
        layers.append(dict(
            ln1_g=jnp.ones((1, channel_dim), jnp.float32),
            ln1_b=jnp.zeros((1, channel_dim), jnp.float32),
            # mlp_1: Mapping(seq_len, seq_len, 2, 'first', last_activation=False)
            w1a=_kaiming_normal(k0, seq_len, seq_len),
            b1a=jnp.zeros((1, seq_len), jnp.float32),
            w1b=_kaiming_normal(k1, seq_len, seq_len),
            b1b=jnp.zeros((1, seq_len), jnp.float32),
            ln2_g=jnp.ones((1, channel_dim), jnp.float32),
            ln2_b=jnp.zeros((1, channel_dim), jnp.float32),
            # mlp_2: Mapping(channel_dim, channel_dim, 2, 'first', last_activation=False)
            w2a=_kaiming_normal(k2, channel_dim, channel_dim),
            b2a=jnp.zeros((1, channel_dim), jnp.float32),
            w2b=_kaiming_normal(k3, channel_dim, channel_dim),
            b2b=jnp.zeros((1, channel_dim), jnp.float32),
        ))
    return dict(w_in=w_in, b_in=b_in, layers=layers)


# -----------------------------------------------------------------------------
# Pure-JAX f32 reference (matches PyTorch eval-mode forward)
# -----------------------------------------------------------------------------
def _ref_forward(x, params, slope=SLOPE):
    # TODO(synk): dropout layers are treated as identity (eval-mode semantics).
    y = _leaky(x @ params["w_in"].T + params["b_in"][0], slope)
    for p in params["layers"]:
        xn = _layernorm(y, p["ln1_g"][0], p["ln1_b"][0])
        xt = jnp.swapaxes(xn, 1, 2)
        h = _leaky(xt @ p["w1a"].T + p["b1a"][0], slope)
        t = h @ p["w1b"].T + p["b1b"][0]
        x2 = jnp.swapaxes(t, 1, 2) + y
        xn2 = _layernorm(x2, p["ln2_g"][0], p["ln2_b"][0])
        h2 = _leaky(xn2 @ p["w2a"].T + p["b2a"][0], slope)
        y = h2 @ p["w2b"].T + p["b2b"][0] + x2
    return y


if __name__ == "__main__":
    # batch, seq_len, input_dim, channel_dim (C=128 keeps output stores lane-dense)
    B, S, D, C = 4, 16, 8, 128
    NLAYERS = 2

    key = jax.random.PRNGKey(0)
    k_x, k_p = jax.random.split(key)
    x = jax.random.normal(k_x, (B, S, D), dtype=jnp.float32)
    params = init_params(k_p, D, C, S, NLAYERS)

    ref = _ref_forward(x, params)

    # f32 matmul path (exact-math check against the f32 reference).
    out = mlp_mixer_forward(x, params, use_bf16_matmul=False)
    out = jax.block_until_ready(out)
    assert out.shape == (B, S, C), out.shape
    assert jnp.allclose(out, ref, atol=2e-3, rtol=2e-3), \
        float(jnp.max(jnp.abs(out - ref)))

    # Default path: bf16 MXU operands, f32 accumulate, f32 LayerNorm / residuals
    # -> only a loose tolerance vs the f32 reference.
    out_bf16 = mlp_mixer_forward(x, params)
    out_bf16 = jax.block_until_ready(out_bf16)
    rel = float(jnp.linalg.norm(out_bf16 - ref) / jnp.linalg.norm(ref))
    assert rel < 8e-2, rel

    print("KERNEL_OK")
</pallas_src>

<mosaic_0001>
module attributes {stable_mosaic.version = 11 : i64} {
  func.func @_fused_mixer_kernel(%arg0: i32, %arg1: i32, %arg2: memref<2x16x8xf32, #tpu.memory_space<vmem>>, %arg3: memref<8x128xf32, #tpu.memory_space<vmem>>, %arg4: memref<1x128xf32, #tpu.memory_space<vmem>>, %arg5: memref<1x16x16xf32, #tpu.memory_space<vmem>>, %arg6: memref<1x16x16xf32, #tpu.memory_space<vmem>>, %arg7: memref<1x128x128xf32, #tpu.memory_space<vmem>>, %arg8: memref<1x128x128xf32, #tpu.memory_space<vmem>>, %arg9: memref<1x6x128xf32, #tpu.memory_space<vmem>>, %arg10: memref<1x16x2xf32, #tpu.memory_space<vmem>>, %arg11: memref<2x16x128xf32, #tpu.memory_space<vmem>>) attributes {dimension_semantics = [#tpu.dimension_semantics<parallel>, #tpu.dimension_semantics<arbitrary>], iteration_bounds = array<i64: 2, 2>, scalar_prefetch = 0 : i64, scratch_operands = 0 : i64, tpu.core_type = #tpu.core_type<tc>, window_params = [{transform_indices = @transform_0, window_bounds = array<i64: 2, 16, 8>}, {pipeline_mode = #tpu.pipeline_mode<synchronous>, transform_indices = @transform_1, window_bounds = array<i64: 8, 128>}, {pipeline_mode = #tpu.pipeline_mode<synchronous>, transform_indices = @transform_2, window_bounds = array<i64: 1, 128>}, {transform_indices = @transform_3, window_bounds = array<i64: 1, 16, 16>}, {transform_indices = @transform_4, window_bounds = array<i64: 1, 16, 16>}, {transform_indices = @transform_5, window_bounds = array<i64: 1, 128, 128>}, {transform_indices = @transform_6, window_bounds = array<i64: 1, 128, 128>}, {transform_indices = @transform_7, window_bounds = array<i64: 1, 6, 128>}, {transform_indices = @transform_8, window_bounds = array<i64: 1, 16, 2>}, {transform_indices = @transform_9, window_bounds = array<i64: 2, 16, 128>}]} {
    %c0_i32 = arith.constant 0 : i32
    %0 = arith.cmpi eq, %arg1, %c0_i32 : i32
    %1 = arith.extui %0 : i1 to i32
    %c0_i32_0 = arith.constant 0 : i32
    %2 = arith.cmpi ne, %1, %c0_i32_0 : i32
    scf.if %2 {
      %c0_41 = arith.constant 0 : index
      %c0_42 = arith.constant 0 : index
      %c0_43 = arith.constant 0 : index
      %109 = vector.load %arg2[%c0_41, %c0_42, %c0_43] : memref<2x16x8xf32, #tpu.memory_space<vmem>>, vector<2x16x8xf32>
      %110 = vector.shape_cast %109 : vector<2x16x8xf32> to vector<32x8xf32>
      %c0_44 = arith.constant 0 : index
      %c0_45 = arith.constant 0 : index
      %111 = vector.load %arg3[%c0_44, %c0_45] : memref<8x128xf32, #tpu.memory_space<vmem>>, vector<8x128xf32>
      %cst_46 = arith.constant dense<0.000000e+00> : vector<32x128xf32>
      %112 = tpu.matmul %110, %111, %cst_46 {dimension_numbers = #tpu.dot_dimension_numbers<[1], [0], [0], [1], [0, 0, 1, 1], [], []>} : vector<32x8xf32>, vector<8x128xf32>, vector<32x128xf32> -> vector<32x128xf32>
      %c0_47 = arith.constant 0 : index
      %c0_48 = arith.constant 0 : index
      %113 = vector.load %arg4[%c0_47, %c0_48] : memref<1x128xf32, #tpu.memory_space<vmem>>, vector<1x128xf32>
      %114 = vector.broadcast %113 : vector<1x128xf32> to vector<32x128xf32>
      %115 = arith.addf %112, %114 : vector<32x128xf32>
      %cst_49 = arith.constant 0.000000e+00 : f32
      %116 = vector.broadcast %cst_49 : f32 to vector<32x128xf32>
      %117 = arith.cmpf oge, %115, %116 : vector<32x128xf32>
      %cst_50 = arith.constant 2.000000e-01 : f32
      %118 = vector.broadcast %cst_50 : f32 to vector<32x128xf32>
      %119 = arith.mulf %118, %115 : vector<32x128xf32>
      %120 = arith.select %117, %115, %119 : vector<32x128xi1>, vector<32x128xf32>
      %121 = vector.shape_cast %120 : vector<32x128xf32> to vector<2x16x128xf32>
      %c0_51 = arith.constant 0 : index
      %c0_52 = arith.constant 0 : index
      %c0_53 = arith.constant 0 : index
      %122 = vector.load %arg11[%c0_51, %c0_52, %c0_53] : memref<2x16x128xf32, #tpu.memory_space<vmem>>, vector<2x16x128xf32>
      tpu.vector_store %arg11[%c0_51, %c0_52, %c0_53], %121 {strides = array<i32>} : memref<2x16x128xf32, #tpu.memory_space<vmem>>, vector<2x16x128xf32>,
    } else {
    }
    %c0 = arith.constant 0 : index
    %c0_1 = arith.constant 0 : index
    %c0_2 = arith.constant 0 : index
    %3 = vector.load %arg11[%c0, %c0_1, %c0_2] : memref<2x16x128xf32, #tpu.memory_space<vmem>>, vector<2x16x128xf32>
    %c0_3 = arith.constant 0 : index
    %c0_4 = arith.constant 0 : index
    %c0_5 = arith.constant 0 : index
    %4 = vector.load %arg9[%c0_3, %c0_4, %c0_5] : memref<1x6x128xf32, #tpu.memory_space<vmem>>, vector<1x6x128xf32>
    %5 = vector.shape_cast %4 : vector<1x6x128xf32> to vector<6x128xf32>
    %6 = vector.extract_strided_slice %5 {offsets = [0, 0], sizes = [1, 128], strides = [1, 1]} : vector<6x128xf32> to vector<1x128xf32>
    %7 = vector.extract_strided_slice %5 {offsets = [1, 0], sizes = [1, 128], strides = [1, 1]} : vector<6x128xf32> to vector<1x128xf32>
    %8 = vector.extract_strided_slice %5 {offsets = [2, 0], sizes = [1, 128], strides = [1, 1]} : vector<6x128xf32> to vector<1x128xf32>
    %9 = vector.extract_strided_slice %5 {offsets = [3, 0], sizes = [1, 128], strides = [1, 1]} : vector<6x128xf32> to vector<1x128xf32>
    %10 = vector.extract_strided_slice %5 {offsets = [4, 0], sizes = [1, 128], strides = [1, 1]} : vector<6x128xf32> to vector<1x128xf32>
    %11 = vector.extract_strided_slice %5 {offsets = [5, 0], sizes = [1, 128], strides = [1, 1]} : vector<6x128xf32> to vector<1x128xf32>
    %c0_6 = arith.constant 0 : index
    %c0_7 = arith.constant 0 : index
    %c0_8 = arith.constant 0 : index
    %12 = vector.load %arg10[%c0_6, %c0_7, %c0_8] : memref<1x16x2xf32, #tpu.memory_space<vmem>>, vector<1x16x2xf32>
    %13 = vector.shape_cast %12 : vector<1x16x2xf32> to vector<16x2xf32>
    %14 = vector.extract_strided_slice %13 {offsets = [0, 0], sizes = [16, 1], strides = [1, 1]} : vector<16x2xf32> to vector<16x1xf32>
    %15 = vector.extract_strided_slice %13 {offsets = [0, 1], sizes = [16, 1], strides = [1, 1]} : vector<16x2xf32> to vector<16x1xf32>
    %cst = arith.constant dense<0.000000e+00> : vector<2x16xf32>
    %16 = vector.multi_reduction <add>, %3, %cst [2] : vector<2x16x128xf32> to vector<2x16xf32>
    %17 = vector.shape_cast %16 : vector<2x16xf32> to vector<2x16x1xf32>
    %cst_9 = arith.constant 1.280000e+02 : f32
    %18 = vector.broadcast %cst_9 : f32 to vector<2x16x1xf32>
    %19 = arith.divf %17, %18 : vector<2x16x1xf32>
    %20 = vector.broadcast %19 : vector<2x16x1xf32> to vector<2x16x128xf32>
    %21 = arith.subf %3, %20 : vector<2x16x128xf32>
    %22 = arith.mulf %21, %21 : vector<2x16x128xf32>
    %cst_10 = arith.constant dense<0.000000e+00> : vector<2x16xf32>
    %23 = vector.multi_reduction <add>, %22, %cst_10 [2] : vector<2x16x128xf32> to vector<2x16xf32>
    %24 = vector.shape_cast %23 : vector<2x16xf32> to vector<2x16x1xf32>
    %cst_11 = arith.constant 1.280000e+02 : f32
    %25 = vector.broadcast %cst_11 : f32 to vector<2x16x1xf32>
    %26 = arith.divf %24, %25 : vector<2x16x1xf32>
    %27 = vector.broadcast %19 : vector<2x16x1xf32> to vector<2x16x128xf32>
    %28 = arith.subf %3, %27 : vector<2x16x128xf32>
    %cst_12 = arith.constant 9.99999974E-6 : f32
    %29 = vector.broadcast %cst_12 : f32 to vector<2x16x1xf32>
    %30 = arith.addf %26, %29 : vector<2x16x1xf32>
    %31 = math.rsqrt %30 : vector<2x16x1xf32>
    %32 = vector.broadcast %31 : vector<2x16x1xf32> to vector<2x16x128xf32>
    %33 = arith.mulf %28, %32 : vector<2x16x128xf32>
    %34 = vector.shape_cast %6 : vector<1x128xf32> to vector<1x1x128xf32>
    %35 = vector.broadcast %34 : vector<1x1x128xf32> to vector<2x16x128xf32>
    %36 = arith.mulf %33, %35 : vector<2x16x128xf32>
    %37 = vector.shape_cast %7 : vector<1x128xf32> to vector<1x1x128xf32>
    %38 = vector.broadcast %37 : vector<1x1x128xf32> to vector<2x16x128xf32>
    %39 = arith.addf %36, %38 : vector<2x16x128xf32>
    %c0_13 = arith.constant 0 : index
    %c0_14 = arith.constant 0 : index
    %c0_15 = arith.constant 0 : index
    %40 = vector.load %arg5[%c0_13, %c0_14, %c0_15] : memref<1x16x16xf32, #tpu.memory_space<vmem>>, vector<1x16x16xf32>
    %41 = vector.shape_cast %40 : vector<1x16x16xf32> to vector<16x16xf32>
    %c0_16 = arith.constant 0 : index
    %c0_17 = arith.constant 0 : index
    %c0_18 = arith.constant 0 : index
    %42 = vector.load %arg6[%c0_16, %c0_17, %c0_18] : memref<1x16x16xf32, #tpu.memory_space<vmem>>, vector<1x16x16xf32>
    %43 = vector.shape_cast %42 : vector<1x16x16xf32> to vector<16x16xf32>
    %44 = vector.extract_strided_slice %39 {offsets = [0, 0, 0], sizes = [1, 16, 128], strides = [1, 1, 1]} : vector<2x16x128xf32> to vector<1x16x128xf32>
    %45 = vector.shape_cast %44 : vector<1x16x128xf32> to vector<16x128xf32>
    %46 = vector.extract_strided_slice %39 {offsets = [1, 0, 0], sizes = [1, 16, 128], strides = [1, 1, 1]} : vector<2x16x128xf32> to vector<1x16x128xf32>
    %47 = vector.shape_cast %46 : vector<1x16x128xf32> to vector<16x128xf32>
    %48 = tpu.concatenate %45, %47 in 1 : vector<16x128xf32>, vector<16x128xf32> -> vector<16x256xf32>
    %cst_19 = arith.constant dense<0.000000e+00> : vector<16x256xf32>
    %49 = tpu.matmul %41, %48, %cst_19 {dimension_numbers = #tpu.dot_dimension_numbers<[1], [0], [0], [1], [0, 0, 1, 1], [], []>} : vector<16x16xf32>, vector<16x256xf32>, vector<16x256xf32> -> vector<16x256xf32>
    %50 = vector.broadcast %14 : vector<16x1xf32> to vector<16x256xf32>
    %51 = arith.addf %49, %50 : vector<16x256xf32>
    %cst_20 = arith.constant 0.000000e+00 : f32
    %52 = vector.broadcast %cst_20 : f32 to vector<16x256xf32>
    %53 = arith.cmpf oge, %51, %52 : vector<16x256xf32>
    %cst_21 = arith.constant 2.000000e-01 : f32
    %54 = vector.broadcast %cst_21 : f32 to vector<16x256xf32>
    %55 = arith.mulf %54, %51 : vector<16x256xf32>
    %56 = arith.select %53, %51, %55 : vector<16x256xi1>, vector<16x256xf32>
    %cst_22 = arith.constant dense<0.000000e+00> : vector<16x256xf32>
    %57 = tpu.matmul %43, %56, %cst_22 {dimension_numbers = #tpu.dot_dimension_numbers<[1], [0], [0], [1], [0, 0, 1, 1], [], []>} : vector<16x16xf32>, vector<16x256xf32>, vector<16x256xf32> -> vector<16x256xf32>
    %58 = vector.broadcast %15 : vector<16x1xf32> to vector<16x256xf32>
    %59 = arith.addf %57, %58 : vector<16x256xf32>
    %60 = vector.extract_strided_slice %59 {offsets = [0, 0], sizes = [16, 128], strides = [1, 1]} : vector<16x256xf32> to vector<16x128xf32>
    %61 = vector.extract_strided_slice %59 {offsets = [0, 128], sizes = [16, 128], strides = [1, 1]} : vector<16x256xf32> to vector<16x128xf32>
    %62 = vector.shape_cast %60 : vector<16x128xf32> to vector<1x16x128xf32>
    %63 = vector.shape_cast %61 : vector<16x128xf32> to vector<1x16x128xf32>
    %64 = tpu.concatenate %62, %63 in 0 : vector<1x16x128xf32>, vector<1x16x128xf32> -> vector<2x16x128xf32>
    %65 = arith.addf %64, %3 : vector<2x16x128xf32>
    %cst_23 = arith.constant dense<0.000000e+00> : vector<2x16xf32>
    %66 = vector.multi_reduction <add>, %65, %cst_23 [2] : vector<2x16x128xf32> to vector<2x16xf32>
    %67 = vector.shape_cast %66 : vector<2x16xf32> to vector<2x16x1xf32>
    %cst_24 = arith.constant 1.280000e+02 : f32
    %68 = vector.broadcast %cst_24 : f32 to vector<2x16x1xf32>
    %69 = arith.divf %67, %68 : vector<2x16x1xf32>
    %70 = vector.broadcast %69 : vector<2x16x1xf32> to vector<2x16x128xf32>
    %71 = arith.subf %65, %70 : vector<2x16x128xf32>
    %72 = arith.mulf %71, %71 : vector<2x16x128xf32>
    %cst_25 = arith.constant dense<0.000000e+00> : vector<2x16xf32>
    %73 = vector.multi_reduction <add>, %72, %cst_25 [2] : vector<2x16x128xf32> to vector<2x16xf32>
    %74 = vector.shape_cast %73 : vector<2x16xf32> to vector<2x16x1xf32>
    %cst_26 = arith.constant 1.280000e+02 : f32
    %75 = vector.broadcast %cst_26 : f32 to vector<2x16x1xf32>
    %76 = arith.divf %74, %75 : vector<2x16x1xf32>
    %77 = vector.broadcast %69 : vector<2x16x1xf32> to vector<2x16x128xf32>
    %78 = arith.subf %65, %77 : vector<2x16x128xf32>
    %cst_27 = arith.constant 9.99999974E-6 : f32
    %79 = vector.broadcast %cst_27 : f32 to vector<2x16x1xf32>
    %80 = arith.addf %76, %79 : vector<2x16x1xf32>
    %81 = math.rsqrt %80 : vector<2x16x1xf32>
    %82 = vector.broadcast %81 : vector<2x16x1xf32> to vector<2x16x128xf32>
    %83 = arith.mulf %78, %82 : vector<2x16x128xf32>
    %84 = vector.shape_cast %8 : vector<1x128xf32> to vector<1x1x128xf32>
    %85 = vector.broadcast %84 : vector<1x1x128xf32> to vector<2x16x128xf32>
    %86 = arith.mulf %83, %85 : vector<2x16x128xf32>
    %87 = vector.shape_cast %9 : vector<1x128xf32> to vector<1x1x128xf32>
    %88 = vector.broadcast %87 : vector<1x1x128xf32> to vector<2x16x128xf32>
    %89 = arith.addf %86, %88 : vector<2x16x128xf32>
    %90 = vector.shape_cast %89 : vector<2x16x128xf32> to vector<32x128xf32>
    %c0_28 = arith.constant 0 : index
    %c0_29 = arith.constant 0 : index
    %c0_30 = arith.constant 0 : index
    %91 = vector.load %arg7[%c0_28, %c0_29, %c0_30] : memref<1x128x128xf32, #tpu.memory_space<vmem>>, vector<1x128x128xf32>
    %92 = vector.shape_cast %91 : vector<1x128x128xf32> to vector<128x128xf32>
    %c0_31 = arith.constant 0 : index
    %c0_32 = arith.constant 0 : index
    %c0_33 = arith.constant 0 : index
    %93 = vector.load %arg8[%c0_31, %c0_32, %c0_33] : memref<1x128x128xf32, #tpu.memory_space<vmem>>, vector<1x128x128xf32>
    %94 = vector.shape_cast %93 : vector<1x128x128xf32> to vector<128x128xf32>
    %cst_34 = arith.constant dense<0.000000e+00> : vector<32x128xf32>
    %95 = tpu.matmul %90, %92, %cst_34 {dimension_numbers = #tpu.dot_dimension_numbers<[1], [0], [0], [1], [0, 0, 1, 1], [], []>} : vector<32x128xf32>, vector<128x128xf32>, vector<32x128xf32> -> vector<32x128xf32>
    %96 = vector.broadcast %10 : vector<1x128xf32> to vector<32x128xf32>
    %97 = arith.addf %95, %96 : vector<32x128xf32>
    %cst_35 = arith.constant 0.000000e+00 : f32
    %98 = vector.broadcast %cst_35 : f32 to vector<32x128xf32>
    %99 = arith.cmpf oge, %97, %98 : vector<32x128xf32>
    %cst_36 = arith.constant 2.000000e-01 : f32
    %100 = vector.broadcast %cst_36 : f32 to vector<32x128xf32>
    %101 = arith.mulf %100, %97 : vector<32x128xf32>
    %102 = arith.select %99, %97, %101 : vector<32x128xi1>, vector<32x128xf32>
    %cst_37 = arith.constant dense<0.000000e+00> : vector<32x128xf32>
    %103 = tpu.matmul %102, %94, %cst_37 {dimension_numbers = #tpu.dot_dimension_numbers<[1], [0], [0], [1], [0, 0, 1, 1], [], []>} : vector<32x128xf32>, vector<128x128xf32>, vector<32x128xf32> -> vector<32x128xf32>
    %104 = vector.broadcast %11 : vector<1x128xf32> to vector<32x128xf32>
    %105 = arith.addf %103, %104 : vector<32x128xf32>
    %106 = vector.shape_cast %105 : vector<32x128xf32> to vector<2x16x128xf32>
    %107 = arith.addf %106, %65 : vector<2x16x128xf32>
    %c0_38 = arith.constant 0 : index
    %c0_39 = arith.constant 0 : index
    %c0_40 = arith.constant 0 : index
    %108 = vector.load %arg11[%c0_38, %c0_39, %c0_40] : memref<2x16x128xf32, #tpu.memory_space<vmem>>, vector<2x16x128xf32>
    tpu.vector_store %arg11[%c0_38, %c0_39, %c0_40], %107 {strides = array<i32>} : memref<2x16x128xf32, #tpu.memory_space<vmem>>, vector<2x16x128xf32>,
    return
  }
  func.func @transform_0(%arg0: i32, %arg1: i32) -> (i32, i32, i32) {
    %c0_i32 = arith.constant 0 : i32
    %c0_i32_0 = arith.constant 0 : i32
    %c0_i32_1 = arith.constant 0 : i32
    return %arg0, %c0_i32, %c0_i32_0 : i32, i32, i32
  }
  func.func @transform_1(%arg0: i32, %arg1: i32) -> (i32, i32) {
    %c0_i32 = arith.constant 0 : i32
    %c0_i32_0 = arith.constant 0 : i32
    %c0_i32_1 = arith.constant 0 : i32
    return %c0_i32, %c0_i32_0 : i32, i32
  }
  func.func @transform_2(%arg0: i32, %arg1: i32) -> (i32, i32) {
    %c0_i32 = arith.constant 0 : i32
    %c0_i32_0 = arith.constant 0 : i32
    %c0_i32_1 = arith.constant 0 : i32
    return %c0_i32, %c0_i32_0 : i32, i32
  }
  func.func @transform_3(%arg0: i32, %arg1: i32) -> (i32, i32, i32) {
    %c0_i32 = arith.constant 0 : i32
    %c0_i32_0 = arith.constant 0 : i32
    %c0_i32_1 = arith.constant 0 : i32
    return %arg1, %c0_i32, %c0_i32_0 : i32, i32, i32
  }
  func.func @transform_4(%arg0: i32, %arg1: i32) -> (i32, i32, i32) {
    %c0_i32 = arith.constant 0 : i32
    %c0_i32_0 = arith.constant 0 : i32
    %c0_i32_1 = arith.constant 0 : i32
    return %arg1, %c0_i32, %c0_i32_0 : i32, i32, i32
  }
  func.func @transform_5(%arg0: i32, %arg1: i32) -> (i32, i32, i32) {
    %c0_i32 = arith.constant 0 : i32
    %c0_i32_0 = arith.constant 0 : i32
    %c0_i32_1 = arith.constant 0 : i32
    return %arg1, %c0_i32, %c0_i32_0 : i32, i32, i32
  }
  func.func @transform_6(%arg0: i32, %arg1: i32) -> (i32, i32, i32) {
    %c0_i32 = arith.constant 0 : i32
    %c0_i32_0 = arith.constant 0 : i32
    %c0_i32_1 = arith.constant 0 : i32
    return %arg1, %c0_i32, %c0_i32_0 : i32, i32, i32
  }
  func.func @transform_7(%arg0: i32, %arg1: i32) -> (i32, i32, i32) {
    %c0_i32 = arith.constant 0 : i32
    %c0_i32_0 = arith.constant 0 : i32
    %c0_i32_1 = arith.constant 0 : i32
    return %arg1, %c0_i32, %c0_i32_0 : i32, i32, i32
  }
  func.func @transform_8(%arg0: i32, %arg1: i32) -> (i32, i32, i32) {
    %c0_i32 = arith.constant 0 : i32
    %c0_i32_0 = arith.constant 0 : i32
    %c0_i32_1 = arith.constant 0 : i32
    return %arg1, %c0_i32, %c0_i32_0 : i32, i32, i32
  }
  func.func @transform_9(%arg0: i32, %arg1: i32) -> (i32, i32, i32) {
    %c0_i32 = arith.constant 0 : i32
    %c0_i32_0 = arith.constant 0 : i32
    %c0_i32_1 = arith.constant 0 : i32
    return %arg0, %c0_i32, %c0_i32_0 : i32, i32, i32
  }
}

</mosaic_0001>

<bundles_post_ra>
// kernel: tpu_custom_call.1
= control target key start
LH: loop header
LB: loop body
LE: loop exit
PB: predicated region body
PF: predicated region fallthrough
CT: control target
= control target key end

     0   :  { %s2335_s0 = inlined_call_operand.vmem [shape: f32[4,16,8], index: 0, kind: input, shape index: {}]   ;;  %s2336_s1 = inlined_call_operand.vmem [shape: f32[8,128], index: 1, kind: input, shape index: {}]   ;;  %s2337_s2 = inlined_call_operand.vmem [shape: f32[1,128], index: 2, kind: input, shape index: {}]   ;;  %s2338_s3 = inlined_call_operand.vmem [shape: f32[2,16,16], index: 3, kind: input, shape index: {}]   ;;  %s2339_s4 = inlined_call_operand.vmem [shape: f32[2,16,16], index: 4, kind: input, shape index: {}]   ;;  %s2340_s5 = inlined_call_operand.hbm [shape: f32[2,128,128], index: 5, kind: input, shape index: {}]   ;;  %s2341_s6 = inlined_call_operand.hbm [shape: f32[2,128,128], index: 6, kind: input, shape index: {}]   ;;  %s2342_s7 = inlined_call_operand.vmem [shape: f32[2,6,128], index: 7, kind: input, shape index: {}]   ;;  %s2343_s8 = inlined_call_operand.vmem [shape: f32[2,16,2], index: 8, kind: input, shape index: {}]   ;;  %s2344_s9 = inlined_call_operand.hbm [shape: f32[4,16,128], index: 9, kind: output, shape index: {}]  }
   0x1   :  { %2359 = sst [smem:[#allocation23_spill]] %s2340_s5 }
   0x2   :  { %2360 = sst [smem:[#allocation24_spill]] %s2341_s6 }
   0x3   :  { %2361 = sst [smem:[#allocation25_spill]] %s2344_s9 }
   0x4   :  { %14 = vsyncpa [#allocation3], 0 }
   0x5   :  { %16 = vsyncpa [#allocation3 + $0x1], 0 }
   0x6   :  { %17 = vsyncpa [#allocation6], 0 }
   0x7   :  { %19 = vsyncpa [#allocation6 + $0x1], 0 }
   0x8   :  { %20 = vsyncpa [#allocation4], 0 }
   0x9   :  { %22 = vsyncpa [#allocation4 + $0x1], 0  ;;  %s1936_s30 = smov 0   ;;  %s1938_s10 = smov 0  }
   0xa   :  { %s1940_s11 = smov 0   ;;  %s1942_s12 = smov 0  }
   0xb   :  { %s1944_s13 = smov 0   ;;  %s1946_s14 = smov 0  }
   0xc   :  { %s1948_s15 = smov 0   ;;  %s1950_s16 = smov 0  }
   0xd   :  { %s1952_s17 = smov 0   ;;  %s1954_s18 = smov 0  }
   0xe   :  { %s1956_s19 = smov 0  }
   0xf LB: > { %2362 = sst [smem:[#allocation11_spill]] %s1834_s30  ;;  %s1381_s20 = sadd.s32 4294967295, %s1874_s19   ;;  %s1874_s19 = sphi %s1956_s19, %s28_s19   ;;  %s1870_s18 = sphi %s1954_s18, %s2396_s18   ;;  %s1866_s17 = sphi %s1952_s17, %s2395_s17   ;;  %s1862_s16 = sphi %s1950_s16, %s2399_s16   ;;  %s1858_s15 = sphi %s1948_s15, %s2393_s15   ;;  %s1854_s14 = sphi %s1946_s14, %s2392_s14   ;;  %s1850_s13 = sphi %s1944_s13, %s2391_s13   ;;  %s1846_s12 = sphi %s1942_s12, %s2390_s12   ;;  %s1842_s11 = sphi %s1940_s11, %s2389_s11   ;;  %s1838_s10 = sphi %s1938_s10, %s2398_s10   ;;  %s1834_s30 = sphi %s1936_s30, %s2397_s30  }
  0x10   : > { %2363 = sst [smem:[#allocation12_spill]] %s1842_s11  ;;  %s1382_s21 = sadd.s32 4294967294, %s1874_s19  }
  0x11   : > { %2364 = sst [smem:[#allocation13_spill]] %s1850_s13  ;;  %s37_s22 = sadd.s32 1, %s1866_s17 }
  0x12   : > { %2365 = sst [smem:[#allocation14_spill]] %s1854_s14  ;;  %s40_s23 = sadd.s32 1, %s1870_s18 }
  0x13   : > { %2366 = sst [smem:[#allocation15_spill]] %s1866_s17  ;;  %p38_p0 = scmp.ge.s32.totalorder %s37_s22, 2 }
  0x14   : > { %2367 = sst [smem:[#allocation16_spill]] %s1870_s18  ;;  %s167_s24 = sadd.s32 1, %s1854_s14 }
  0x15   : > { %p174_p1 = scmp.ne.s32.totalorder %s1854_s14, %s1850_s13  ;;  %p175_p2 = scmp.eq.s32.totalorder %s1874_s19, 0 }
  0x16   : > { %s2401_s22 = smov (%p38_p0, %s37_s22), 0  ;;  %s2403_s23 = smov (!%p38_p0, %s40_s23), %s1870_s18 }
  0x17   : > { %2368 = sst [smem:[#allocation17_spill]] %s2401_s22  ;;  %s164_s25 = ssub.s32 %s1866_s17, %s2401_s22 }
  0x18   : > { %p2002_p3 = por %p175_p2, %p174_p1  ;;  %p42_p4 = scmp.ge.s32.totalorder %s2403_s23, 2 }
  0x19   : > { %p165_p5 = scmp.eq.s32.totalorder %s164_s25, 0  ;;  %p180_p6 = scmp.ne.s32.totalorder %s1850_s13, %s1846_s12 }
  0x1a   : > { %p181_p7 = scmp.eq.s32.totalorder %s1381_s20, 0  ;;  %s2405_s23 = smov (%p42_p4, %s2403_s23), 0 }
  0x1b   : > { %2370 = sst [smem:[#allocation18_spill]] %s2405_s23  ;;  %s268_s29 = ssub.s32 %s1870_s18, %s2405_s23 }
  0x1c   : > { %s2010_s27 = scalar_select %p165_p5, %s1854_s14, %s167_s24  }
  0x1d   : > { %p2012_p8 = por %p181_p7, %p180_p6  ;;  %p269_p9 = scmp.eq.s32.totalorder %s268_s29, 0 }
  0x1e   : > { %2371 = sst [smem:[#allocation19_spill]] %s2010_s27  ;;  %s271_s22 = sadd.s32 1, %s1842_s11 }
  0x1f   : > { %p281_p10 = scmp.ne.s32.totalorder %s1842_s11, %s1838_s10  ;;  %p282_p11 = scmp.eq.s32.totalorder %s1381_s20, 3 }
  0x20   : > { %s2022_s25 = scalar_select %p269_p9, %s1842_s11, %s271_s22  }
  0x21   : > { %p2024_p12 = por %p282_p11, %p281_p10  ;;  %p287_p13 = scmp.ne.s32.totalorder %s1838_s10, %s1834_s30 }
  0x22   : > { %2373 = sst [smem:[#allocation20_spill]] %s2022_s25  ;;  %p288_p0 = scmp.eq.s32.totalorder %s1382_s21, 3 }
  0x23   : > { %s2374_s12 = scalar_select %p2024_p12, 1, 0 }
  0x24   : > { %p1577_p1 = scmp.lt.s32.totalorder %s1874_s19, 4  ;;  %s2032_s24 = sand.u32 1, %s1854_s14  }
  0x25   : > { %2375 = sst [smem:[#allocation21_spill]] %s2374_s12  ;;  %p2034_p2 = por %p288_p0, %p287_p13 }
  0x26   : > { %s2351_s23 = sshll.u32 %s2032_s24, 7  ;;  %s1421_s20 = sshll.u32 %s1866_s17, 11 }
  0x27   : > { %s2376_s29 = scalar_select %p2034_p2, 1, 0 }
  0x28   : > { %s2378_s5 = sld [smem:[#allocation23_spill]]  ;;  %s344_s25 = scalar_lea.vmem [#allocation2], %s2351_s23 }
  0x29   : > { %2377 = sst [smem:[#allocation22_spill]] %s2376_s29  ;;  %s351_s11 = sshll.u32 %s344_s25, 4  ;;  %s352_s11 = int_to_ptr.vmem [resolvable:$true] %s351_s11 }
  0x2a   : > { %p2047_p4 = pnand %p1577_p1, %p2002_p3  ;;  %s341_s14 = scalar_lea.sflag [#allocation3], %s2032_s24 }
  0x2b   : > { %s1707_s29 = scalar_lea.vmem %s352_s11, 2048  ;;  %s1876_s18 = smov [#allocation2]  }
  0x2c   : > { %p1696_p5 = pneg %p2047_p4  ;;  %p1708_p6 = scmp.ne.s32.totalorder %s352_s11, %s1707_s29 }
  0x2d   : > { %s1712_s22 = sshll.u32 %s1876_s18, 4  ;;  %s1713_s22 = int_to_ptr.vmem [resolvable:$false] %s1712_s22 }
  0x2e   : > { %s350_s27 = scalar_lea.hbm %s2378_s5, %s1421_s20  ;;  %p1710_p7 = pnand %p1708_p6, %p1696_p5 }
  0x2f   : > { %s1714_s26 = scalar_lea.vmem %s1713_s22, 4096  ;;  %p1715_p3 = scmp.lt.s32.totalorder %s352_s11, %s1713_s22 }
  0x30   : > { %p1711_p9 = pneg %p1710_p7  ;;  %p1716_p10 = scmp.lt.s32.totalorder %s1714_s26, %s1707_s29 }
  0x32   : > { %p1717_p11 = por %p1716_p10, %p1715_p3 }
  0x34   : > { %p1718_p13 = pnand %p1717_p11, %p1711_p9 }
  0x36   : > { %1721 = shalt.err (!%p1718_p13)
}
  0x37   : > { %s1877_s25 = smov 128   ;;  %s1878_s23 = smov 8  }
  0x38   : > { %1569 = dma.hbm_to_vmem [thread:$0]  (!%p2047_p4), %s350_s27, 2048, %s352_s11, %s341_s14, %s1877_s25, %s1877_s25, %s1878_s23  }
  0x39   : > { %p1391_p0 = scmp.ge.s32.totalorder %s1874_s19, 1  ;;  %p395_p1 = scmp.lt.s32.totalorder %s1874_s19, 5 }
  0x3a   : > { %s2381_s6 = sld [smem:[#allocation24_spill]]  ;;  %s2382_s5 = sshll.u32 %s2032_s24, 7 }
  0x3b   : > { %p2061_p6 = pnand %p1391_p0, %p395_p1  ;;  %s365_s17 = scalar_lea.vmem [#allocation5], %s2382_s5 }
  0x3c   : > { %s372_s30 = sshll.u32 %s365_s17, 4  ;;  %s362_s9 = scalar_lea.sflag [#allocation6], %s2032_s24  ;;  %s373_s30 = int_to_ptr.vmem [resolvable:$true] %s372_s30 }
  0x3d   : > { %s1735_s12 = scalar_lea.vmem %s373_s30, 2048  ;;  %s1879_s11 = smov [#allocation5]  }
  0x3e   : > { %p1736_p7 = scmp.ne.s32.totalorder %s373_s30, %s1735_s12  ;;  %s1740_s14 = sshll.u32 %s1879_s11, 4  ;;  %s1741_s14 = int_to_ptr.vmem [resolvable:$false] %s1740_s14 }
  0x3f   : > { %s1742_s27 = scalar_lea.vmem %s1741_s14, 4096  ;;  %p1743_p10 = scmp.lt.s32.totalorder %s373_s30, %s1741_s14 }
  0x40   : > { %s371_s26 = scalar_lea.hbm %s2381_s6, %s1421_s20  ;;  %p1738_p9 = pnand %p1736_p7, %p1696_p5 }
  0x41   : > { %p1744_p11 = scmp.lt.s32.totalorder %s1742_s27, %s1735_s12 }
  0x42   : > { %p1739_p3 = pneg %p1738_p9 }
  0x43   : > { %p1745_p13 = por %p1744_p11, %p1743_p10 }
  0x45   : > { %p1746_p0 = pnand %p1745_p13, %p1739_p3 }
  0x47   : > { %1749 = shalt.err (!%p1746_p0)
}
  0x48   : > { %1572 = dma.hbm_to_vmem [thread:$0]  (!%p2047_p4), %s371_s26, 2048, %s373_s30, %s362_s9, %s1877_s25, %s1877_s25, %s1878_s23  }
  0x49   : > { %399 = sbr.rel (%p2061_p6) target bundleno = 1750 (0x6d6), region = 56  ;;  %s401_s5 = sand.u32 (!%p2061_p6), 1, %s1850_s13  }
  0x4a   : > { %s1392_s17 = sshll.u32 (!%p2061_p6), %s401_s5, 7  ;;  %s402_s24 = scalar_lea.sflag (!%p2061_p6), [#allocation3], %s401_s5 }
  0x4b   : > { %s2079_s20 = scalar_lea.vmem (!%p2061_p6), [#allocation2], %s1392_s17 }
  0x4e   : > { %1821 = dma.done.wait (%p2012_p8), %s402_s24, 2048  }
  0x4f   : > { %1823 = vsyncadd (%p2012_p8), %s402_s24, 4294965248  ;;  %s411_s12 = scalar_lea.sflag [#allocation6], %s401_s5  ;;  %s2085_s29 = scalar_lea.vmem [#allocation5], %s1392_s17 }
  0x50   : > { %1825 = dma.done.wait (%p2012_p8), %s411_s12, 2048  }
  0x51   : > { %1827 = vsyncadd (%p2012_p8), %s411_s12, 4294965248  ;;  %s2357_s9 = sand.u32 1, %s1838_s10   ;;  %s1395_s30 = sshll.u32 %s1862_s16, 1 }
  0x52   : > { %s1394_s23 = sshll.u32 %s2357_s9, 5  ;;  %p480_p4 = scmp.lt.s32.totalorder %s1395_s30, 3 }
  0x53   : > { %p486_p5 = scmp.lt.s32.totalorder %s1858_s15, 1  ;;  %s2120_s22 = scalar_lea.vmem [#allocation7], %s1394_s23 }
  0x54   : > { %s2407_s30 = smov (!%p480_p4, %s1395_s30), 3  ;;  %p1405_p8 = scmp.ne.s32.totalorder %s1858_s15, 0 }
  0x55   : > { %s487_s21 = scalar_select %p486_p5, %s1858_s15, 1 }
  0x56   : > { %s1423_s25 = sshll.u32 %s2407_s30, 4  ;;  %509 = sbr.rel (%p1405_p8) target bundleno = 298 (0x12a), region = 68 }
  0x57   : > { %s484_s26 = scalar_lea.vmem %s2335_s0, %s1423_s25  ;;  %s1424_s28 = sshll.u32 %s487_s21, 4 }
  0x58   : > { %s2103_s27 = scalar_lea.vmem %s2338_s3, %s1424_s28  ;;  %s2108_s24 = scalar_lea.vmem %s2339_s4, %s1424_s28 }
  0x59   : > { %s1402_s12 = sshll.u32 %s487_s21, 3  ;;  %s2113_s30 = scalar_lea.vmem %s2343_s8, %s1424_s28 }
  0x5a   : > { %s2118_s25 = scalar_lea.vmem %s2342_s7, %s1402_s12 }
  0x5b   : > { %v514_v0 = vld [vmem:[%s2336_s1] sm:$0xff]  ;;  %vm522_vm0 = vcmask 64512   ;;  %v512_v2 = vld [vmem:[%s484_s26 + $0x10] sm:$0xff]  ;;  %v511_v3 = vld [vmem:[%s484_s26 + $0x8] sm:$0xff] }
  0x5c   : > { %v510_v1 = vld [vmem:[%s484_s26] sm:$0xff]  ;;  %1474 = vmatprep.subr.mxu0 %v514_v0  ;;  %1558 = vmatprep.subr.mxu1 %v514_v0  ;;  %v513_v4 = vld [vmem:[%s484_s26 + $0x18] sm:$0xff] }
  0x5d   : > { %1475 = vmatpush3.msra.mxu0 %v514_v0  ;;  %1559 = vmatpush3.msra.mxu1 %v514_v0  ;;  %v1406_v5 = vld [vmem:[%s2337_s2] ss:$0 sm:$0xff] }
  0x5e   : > { %1476 = vmatprep.mubr.msk.f32.mxu0 %vm522_vm0, %v510_v1  ;;  %1479 = vmatprep.mubr.msk.f32.mxu1 %vm522_vm0, %v512_v2 }
  0x5f   : > { %1477 = vmatmul.mubr.msk.f32.vlgmr.msra.gmra.mxu0 %vm522_vm0, %v511_v3  ;;  %1480 = vmatmul.mubr.msk.f32.vlgmr.msra.gmra.mxu1 %vm522_vm0, %v513_v4 }
 0x11f   : > { %v1478_v6 = vpop.f32.mrf.mxu0  ;;  %v1481_v7 = vpop.f32.mrf.mxu1 }
 0x120   : > { %v607_v8 = vadd.f32 %v1478_v6, %v1406_v5  ;;  %v617_v9 = vadd.f32 %v1481_v7, %v1406_v5 }
 0x121   : > { %v601_v10 = vpop.f32.mrf.mxu0  ;;  %v611_v11 = vpop.f32.mrf.mxu1 }
 0x122   : > { %vm621_vm1 = vcmp.ge.f32.partialorder %v607_v8, 0.0  ;;  %v625_v12 = vmul.f32 0.2, %v607_v8  ;;  %vm623_vm2 = vcmp.ge.f32.partialorder %v617_v9, 0.0  ;;  %v627_v13 = vmul.f32 0.2, %v617_v9 }
 0x123   : > { %v602_v14 = vadd.f32 %v1406_v5, %v601_v10  ;;  %v612_v15 = vadd.f32 %v1406_v5, %v611_v11 }
 0x124   : > { %v629_v16 = vsel %vm621_vm1, %v607_v8, %v625_v12  ;;  %v631_v17 = vsel %vm623_vm2, %v617_v9, %v627_v13 }
 0x125   : > { %633 = vst [vmem:[%s2120_s22 + $0x8] sm:$0xff] %v629_v16  ;;  %635 = vst [vmem:[%s2120_s22 + $0x18] sm:$0xff] %v631_v17  ;;  %vm620_vm3 = vcmp.ge.f32.partialorder %v602_v14, 0.0  ;;  %v624_v18 = vmul.f32 0.2, %v602_v14  ;;  %vm622_vm4 = vcmp.ge.f32.partialorder %v612_v15, 0.0 }
 0x126   : > { %v626_v19 = vmul.f32 0.2, %v612_v15 }
 0x127   : > { %v628_v20 = vsel %vm620_vm3, %v602_v14, %v624_v18 }
 0x128   : > { %v630_v21 = vsel %vm622_vm4, %v612_v15, %v626_v19  ;;  %632 = vst [vmem:[%s2120_s22] sm:$0xff] %v628_v20 }
 0x129   : > { %634 = vst [vmem:[%s2120_s22 + $0x10] sm:$0xff] %v630_v21 }
 0x12a PF: > { %v1880_v42 = vmov 0.0   ;;  %v641_v43 = vld [vmem:[%s2113_s30] sm:$0xff]  ;;  %v642_v44 = vld [vmem:[%s2113_s30 + $0x8] sm:$0xff]  ;;  %v1881_v45 = vmov 0   ;;  %v688_v53 = vlaneseq  ;;  %vm718_vm5 = vcmask 130048   ;;  %s2384_s21 = sld [smem:[#allocation25_spill]] }
 0x12b   : > { %789 = vmatprep.mubr.f32.mxu0 %v1880_v42  ;;  %892 = vmatprep.mubr.f32.mxu1 %v1880_v42  ;;  %v2161_v61 = vld [vmem:[%s2118_s25] sm:$0x3f]  ;;  %v705_v18 = vld [vmem:[%s2103_s27 + $0x8] sm:$0xff]  ;;  %v1882_v19 = vmov 1   ;;  %s1883_s5 = smov [#allocation7]  }
 0x12c   : > { %v2134_v22 = vld [vmem:[%s2120_s22 + $0x18] sm:$0xff]  ;;  %v2142_v24 = vld [vmem:[%s2120_s22 + $0x8] sm:$0xff]  ;;  %1675 = vset.pattern.permute.xlu1 %v1881_v45  ;;  %1674 = vset.pattern.permute.xlu0 %v1881_v45  ;;  %v2157_v58 = vshrl.u32 %v688_v53, 7  ;;  %v704_v17 = vld [vmem:[%s2103_s27] sm:$0xff]  ;;  %s1754_s17 = sshll.u32 %s1883_s5, 4  ;;  %s1755_s17 = int_to_ptr.vmem [resolvable:$false] %s1754_s17 }
 0x12d   : > { %649 = vadd.xlane.f32.xlu0 %v2134_v22 }
 0x12e   : > { %v690_v60 = vsub.s32 0, %v2157_v58  ;;  %v698_v62 = vsub.s32 1, %v2157_v58 }
 0x12f   : > { %v2145_v25 = vld [vmem:[%s2120_s22] sm:$0xff] }
 0x130   : > { %v2137_v23 = vld [vmem:[%s2120_s22 + $0x10] sm:$0xff]  ;;  %v691_v63 = vrot.slane %v2161_v61, %v690_v60  ;;  %v699_v2 = vrot.slane %v2161_v61, %v698_v62 }
 0x131   : > { %647 = vadd.xlane.f32.xlu1 %v2137_v23  ;;  %645 = vadd.xlane.f32.xlu0 %v2142_v24 }
 0x135   : > { %643 = vadd.xlane.f32.xlu1 %v2145_v25 }
 0x1b6   : > { %v650_v26 = vpop.xlane.xlu0 %649 }
 0x1b7   : > { %v655_v28 = vmul.f32 0.0078125, %v650_v26 }
 0x1b9   : > { %v659_v30 = vsub.f32 %v2134_v22, %v655_v28 }
 0x1ba   : > { %v648_v27 = vpop.xlane.xlu1 %647  ;;  %v646_v32 = vpop.xlane.xlu0 %645 }
 0x1bb   : > { %v654_v29 = vmul.f32 0.0078125, %v648_v27  ;;  %v653_v34 = vmul.f32 0.0078125, %v646_v32  ;;  %v663_v35 = vmul.f32 %v659_v30, %v659_v30 }
 0x1bd   : > { %v658_v31 = vsub.f32 %v2137_v23, %v654_v29  ;;  %v657_v37 = vsub.f32 %v2142_v24, %v653_v34  ;;  %670 = vadd.xlane.f32.xlu0 %v663_v35 }
 0x1be   : > { %v644_v33 = vpop.xlane.xlu1 %643 }
 0x1bf   : > { %v652_v36 = vmul.f32 0.0078125, %v644_v33  ;;  %v662_v39 = vmul.f32 %v658_v31, %v658_v31  ;;  %v661_v40 = vmul.f32 %v657_v37, %v657_v37 }
 0x1c1   : > { %v656_v38 = vsub.f32 %v2145_v25, %v652_v36  ;;  %668 = vadd.xlane.f32.xlu0 %v662_v39  ;;  %666 = vadd.xlane.f32.xlu1 %v661_v40 }
 0x1c3   : > { %v660_v41 = vmul.f32 %v656_v38, %v656_v38 }
 0x1c5   : > { %664 = vadd.xlane.f32.xlu1 %v660_v41  ;;  %v706_v41 = vld [vmem:[%s2108_s24] sm:$0xff] }
 0x1d6   : > { %710 = vperm.xlu1 %1675, %v641_v43  }
 0x1d7   : > { %715 = vperm.xlu0 %1674, %v642_v44  }
 0x1da   : > { %1676 = vset.pattern.permute.xlu1 %v1882_v19 }
 0x1db   : > { %1677 = vset.pattern.permute.xlu0 %v1882_v19  ;;  %815 = vperm.xlu1 %1676, %v641_v43   ;;  %v973_v19 = vld [vmem:[%s2079_s20 + $0x20] sm:$0xff] }
 0x1df   : > { %819 = vperm.xlu1 %1676, %v642_v44   ;;  %v707_v44 = vld [vmem:[%s2108_s24 + $0x8] sm:$0xff]  ;;  %s1756_s24 = scalar_lea.vmem %s1755_s17, 1024 }
 0x246   : > { %v671_v46 = vpop.xlane.xlu0 %670 }
 0x247   : > { %v675_v47 = vmul.f32 0.0078125, %v671_v46 }
 0x249   : > { %v679_v48 = vadd.f32 1e-05, %v675_v47 }
 0x24a   : > { %v669_v49 = vpop.xlane.xlu0 %668  ;;  %v667_v50 = vpop.xlane.xlu1 %666 }
 0x24b   : > { %1678 = vrsqrt.f32 %v679_v48  ;;  %v674_v51 = vmul.f32 0.0078125, %v669_v49  ;;  %v673_v52 = vmul.f32 0.0078125, %v667_v50 }
 0x24d   : > { %v678_v54 = vadd.f32 1e-05, %v674_v51  ;;  %v677_v55 = vadd.f32 1e-05, %v673_v52 }
 0x24e   : > { %v665_v56 = vpop.xlane.xlu1 %664 }
 0x24f   : > { %1680 = vrsqrt.f32 %v678_v54  ;;  %v672_v57 = vmul.f32 0.0078125, %v665_v56 }
 0x250   : > { %1682 = vrsqrt.f32 %v677_v55 }
 0x251   : > { %v676_v59 = vadd.f32 1e-05, %v672_v57  ;;  %v984_v57 = vld [vmem:[%s2079_s20 + $0x78] sm:$0xff] }
 0x252   : > { %v716_v26 = vpop.permute.xlu0 %715  ;;  %v711_v27 = vpop.permute.xlu1 %710 }
 0x253   : > { %1684 = vrsqrt.f32 %v676_v59  ;;  %v983_v59 = vld [vmem:[%s2079_s20 + $0x70] sm:$0xff] }
 0x256   : > { %v816_v45 = vpop.permute.xlu1 %815 }
 0x258   : > { %v1679_v0 = vpop.eup %1678 }
 0x259   : > { %v687_v1 = vmul.f32 %v1679_v0, %v659_v30 }
 0x25a   : > { %v820_v51 = vpop.permute.xlu1 %819 }
 0x25b   : > { %v695_v3 = vmul.f32 %v691_v63, %v687_v1 }
 0x25c   : > { %v1681_v4 = vpop.eup %1680 }
 0x25d   : > { %v1683_v5 = vpop.eup %1682  ;;  %v703_v6 = vadd.f32 %v699_v2, %v695_v3  ;;  %v686_v7 = vmul.f32 %v1681_v4, %v658_v31 }
 0x25e   : > { %v685_v8 = vmul.f32 %v1683_v5, %v657_v37 }
 0x25f   : > { %753 = vmatprep.subr.mxu0 %v703_v6  ;;  %v694_v9 = vmul.f32 %v691_v63, %v686_v7 }
 0x260   : > { %v1685_v10 = vpop.eup %1684  ;;  %v693_v11 = vmul.f32 %v691_v63, %v685_v8 }
 0x261   : > { %v702_v12 = vadd.f32 %v699_v2, %v694_v9  ;;  %v684_v13 = vmul.f32 %v1685_v10, %v656_v38  ;;  %v982_v10 = vld [vmem:[%s2079_s20 + $0x68] sm:$0xff] }
 0x262   : > { %v701_v14 = vadd.f32 %v699_v2, %v693_v11  ;;  %v981_v11 = vld [vmem:[%s2079_s20 + $0x60] sm:$0xff] }
 0x263   : > { %v692_v15 = vmul.f32 %v691_v63, %v684_v13  ;;  %v979_v13 = vld [vmem:[%s2079_s20 + $0x50] sm:$0xff] }
 0x264   : > { %754 = vmatpush1.msra.mxu0 %v701_v14  ;;  %v978_v14 = vld [vmem:[%s2079_s20 + $0x48] sm:$0xff] }
 0x265   : > { %755 = vmatprep.subr.mxu0 %v702_v12  ;;  %v700_v16 = vadd.f32 %v699_v2, %v692_v15  ;;  %v980_v12 = vld [vmem:[%s2079_s20 + $0x58] sm:$0xff]  ;;  %v977_v15 = vld [vmem:[%s2079_s20 + $0x40] sm:$0xff] }
 0x267   : > { %756 = vmatpush1.msra.mxu0 %v700_v16  ;;  %v976_v16 = vld [vmem:[%s2079_s20 + $0x38] sm:$0xff] }
 0x268   : > { %1411 = vmatmul.mubr.msk.f32.vlgmr.msra.gmra.mxu0 %vm718_vm5, %v704_v17  ;;  %1482 = vmatprep.subr.mxu0 %v984_v57  ;;  %v975_v17 = vld [vmem:[%s2079_s20 + $0x30] sm:$0xff] }
 0x269   : > { %795 = vmatprep.mubr.f32.mxu0 %v1880_v42  ;;  %1483 = vmatpush3.msra.mxu0 %v984_v57 }
 0x26a   : > { %1484 = vmatprep.subr.mxu0 %v983_v59 }
 0x26b   : > { %1485 = vmatpush3.msra.mxu0 %v983_v59 }
 0x26c   : > { %1412 = vmatmul.mubr.msk.f32.gmra.mxu0 %vm718_vm5, %v705_v18  ;;  %1486 = vmatprep.subr.mxu0 %v982_v10  ;;  %v974_v18 = vld [vmem:[%s2079_s20 + $0x28] sm:$0xff] }
 0x26d   : > { %1487 = vmatpush3.msra.mxu0 %v982_v10 }
 0x26e   : > { %1488 = vmatprep.subr.mxu0 %v981_v11 }
 0x26f   : > { %1489 = vmatpush3.msra.mxu0 %v981_v11 }
 0x270   : > { %1490 = vmatprep.subr.mxu0 %v980_v12 }
 0x271   : > { %1491 = vmatpush3.msra.mxu0 %v980_v12 }
 0x272   : > { %1492 = vmatprep.subr.mxu0 %v979_v13 }
 0x273   : > { %1493 = vmatpush3.msra.mxu0 %v979_v13  ;;  %v988_v13 = vld [vmem:[%s2085_s29 + $0x18] sm:$0xff] }
 0x274   : > { %1494 = vmatprep.subr.mxu0 %v978_v14 }
 0x275   : > { %1495 = vmatpush3.msra.mxu0 %v978_v14  ;;  %v985_v14 = vld [vmem:[%s2085_s29] sm:$0xff] }
 0x276   : > { %1496 = vmatprep.subr.mxu0 %v977_v15 }
 0x277   : > { %1497 = vmatpush3.msra.mxu0 %v977_v15 }
 0x278   : > { %1498 = vmatprep.subr.mxu0 %v976_v16 }
 0x279   : > { %1499 = vmatpush3.msra.mxu0 %v976_v16 }
 0x27a   : > { %1500 = vmatprep.subr.mxu0 %v975_v17 }
 0x27b   : > { %1501 = vmatpush3.msra.mxu0 %v975_v17 }
 0x27c   : > { %1502 = vmatprep.subr.mxu0 %v974_v18 }
 0x27d   : > { %1503 = vmatpush3.msra.mxu0 %v974_v18 }
 0x27e   : > { %1504 = vmatprep.subr.mxu0 %v973_v19 }
 0x27f   : > { %1505 = vmatpush3.msra.mxu0 %v973_v19 }
 0x328   : > { %v791_v20 = vpop.f32.mrf.mxu0 }
 0x329   : > { %v792_v31 = vadd.f32 %v791_v20, %v711_v27  ;;  %v972_v20 = vld [vmem:[%s2079_s20 + $0x18] sm:$0xff] }
 0x32a   : > { %v793_v21 = vpop.f32.mrf.mxu0  ;;  %1506 = vmatprep.subr.mxu0 %v972_v20 }
 0x32b   : > { %v794_v29 = vadd.f32 %v793_v21, %v711_v27  ;;  %v806_v37 = vmul.f32 0.2, %v792_v31  ;;  %vm802_vm9 = vcmp.ge.f32.partialorder %v792_v31, 0.0  ;;  %1507 = vmatpush3.msra.mxu0 %v972_v20  ;;  %v971_v21 = vld [vmem:[%s2079_s20 + $0x10] sm:$0xff]  ;;  %v969_v27 = vld [vmem:[%s2079_s20] sm:$0xff] }
 0x32c   : > { %v797_v28 = vpop.f32.mrf.mxu0  ;;  %1508 = vmatprep.subr.mxu0 %v971_v21 }
 0x32d   : > { %v798_v30 = vadd.f32 %v797_v28, %v716_v26  ;;  %v807_v35 = vmul.f32 0.2, %v794_v29  ;;  %vm803_vm8 = vcmp.ge.f32.partialorder %v794_v29, 0.0  ;;  %v810_v43 = vsel %vm802_vm9, %v792_v31, %v806_v37  ;;  %1509 = vmatpush3.msra.mxu0 %v971_v21  ;;  %v1000_v28 = vld [vmem:[%s2085_s29 + $0x78] sm:$0xff]  ;;  %v997_v31 = vld [vmem:[%s2085_s29 + $0x60] sm:$0xff]  ;;  %v991_v37 = vld [vmem:[%s2085_s29 + $0x30] sm:$0xff] }
 0x32e   : > { %v799_v32 = vpop.f32.mrf.mxu0 }
 0x32f   : > { %v800_v33 = vadd.f32 %v799_v32, %v716_v26  ;;  %v808_v34 = vmul.f32 0.2, %v798_v30  ;;  %vm804_vm7 = vcmp.ge.f32.partialorder %v798_v30, 0.0  ;;  %v811_v40 = vsel %vm803_vm8, %v794_v29, %v807_v35  ;;  %v970_v26 = vld [vmem:[%s2079_s20 + $0x8] sm:$0xff]  ;;  %v999_v29 = vld [vmem:[%s2085_s29 + $0x70] sm:$0xff]  ;;  %v996_v32 = vld [vmem:[%s2085_s29 + $0x58] sm:$0xff] }
 0x330   : > { %1510 = vmatprep.subr.mxu0 %v970_v26  ;;  %v993_v35 = vld [vmem:[%s2085_s29 + $0x40] sm:$0xff]  ;;  %s1428_s20 = sshll.u32 %s1862_s16, 9  ;;  %s2385_s16 = sand.u32 1, %s1838_s10  }
 0x331   : > { %vm805_vm6 = vcmp.ge.f32.partialorder %v800_v33, 0.0  ;;  %v809_v36 = vmul.f32 0.2, %v800_v33  ;;  %v812_v39 = vsel %vm804_vm7, %v798_v30, %v808_v34  ;;  %1511 = vmatpush3.msra.mxu0 %v970_v26  ;;  %v998_v30 = vld [vmem:[%s2085_s29 + $0x68] sm:$0xff]  ;;  %s2266_s26 = scalar_lea.hbm %s2384_s21, %s1428_s20  ;;  %s2275_s28 = scalar_lea.sflag [#allocation4], %s2385_s16 }
 0x332   : > { %1512 = vmatprep.subr.mxu0 %v969_v27  ;;  %v994_v34 = vld [vmem:[%s2085_s29 + $0x48] sm:$0xff] }
 0x333   : > { %v813_v38 = vsel %vm805_vm6, %v800_v33, %v809_v36  ;;  %1513 = vmatpush3.msra.mxu0 %v969_v27  ;;  %v995_v33 = vld [vmem:[%s2085_s29 + $0x50] sm:$0xff]  ;;  %v992_v36 = vld [vmem:[%s2085_s29 + $0x38] sm:$0xff] }
 0x334   : > { %856 = vmatprep.subr.mxu1 %v813_v38  ;;  %v990_v38 = vld [vmem:[%s2085_s29 + $0x28] sm:$0xff] }
 0x335   : > { %857 = vmatpush1.msra.mxu1 %v812_v39  ;;  %v989_v39 = vld [vmem:[%s2085_s29 + $0x20] sm:$0xff] }
 0x336   : > { %858 = vmatprep.subr.mxu1 %v811_v40 }
 0x337   : > { %859 = vmatpush1.msra.mxu1 %v810_v43 }
 0x338   : > { %1413 = vmatmul.mubr.msk.f32.vlgmr.msra.gmra.mxu1 %vm718_vm5, %v706_v41  ;;  %1520 = vmatprep.subr.mxu1 %v1000_v28 }
 0x339   : > { %898 = vmatprep.mubr.f32.mxu1 %v1880_v42  ;;  %1521 = vmatpush3.msra.mxu1 %v1000_v28 }
 0x33a   : > { %1522 = vmatprep.subr.mxu1 %v999_v29 }
 0x33b   : > { %1523 = vmatpush3.msra.mxu1 %v999_v29 }
 0x33c   : > { %1414 = vmatmul.mubr.msk.f32.gmra.mxu1 %vm718_vm5, %v707_v44  ;;  %1524 = vmatprep.subr.mxu1 %v998_v30 }
 0x33d   : > { %1525 = vmatpush3.msra.mxu1 %v998_v30 }
 0x33e   : > { %1526 = vmatprep.subr.mxu1 %v997_v31 }
 0x33f   : > { %1527 = vmatpush3.msra.mxu1 %v997_v31 }
 0x340   : > { %1528 = vmatprep.subr.mxu1 %v996_v32 }
 0x341   : > { %1529 = vmatpush3.msra.mxu1 %v996_v32 }
 0x342   : > { %1530 = vmatprep.subr.mxu1 %v995_v33 }
 0x343   : > { %1531 = vmatpush3.msra.mxu1 %v995_v33 }
 0x344   : > { %1532 = vmatprep.subr.mxu1 %v994_v34 }
 0x345   : > { %1533 = vmatpush3.msra.mxu1 %v994_v34 }
 0x346   : > { %1534 = vmatprep.subr.mxu1 %v993_v35 }
 0x347   : > { %1535 = vmatpush3.msra.mxu1 %v993_v35 }
 0x348   : > { %1536 = vmatprep.subr.mxu1 %v992_v36 }
 0x349   : > { %1537 = vmatpush3.msra.mxu1 %v992_v36  ;;  %v1104_v36 = vsub.s32 5, %v2157_v58 }
 0x34a   : > { %1538 = vmatprep.subr.mxu1 %v991_v37 }
 0x34b   : > { %1539 = vmatpush3.msra.mxu1 %v991_v37  ;;  %v1105_v37 = vrot.slane %v2161_v61, %v1104_v36 }
 0x34c   : > { %1540 = vmatprep.subr.mxu1 %v990_v38 }
 0x34d   : > { %1541 = vmatpush3.msra.mxu1 %v990_v38 }
 0x34e   : > { %1542 = vmatprep.subr.mxu1 %v989_v39 }
 0x34f   : > { %1543 = vmatpush3.msra.mxu1 %v989_v39 }
 0x350   : > { %1544 = vmatprep.subr.mxu1 %v988_v13 }
 0x351   : > { %1545 = vmatpush3.msra.mxu1 %v988_v13 }
 0x3f8   : > { %v894_v46 = vpop.f32.mrf.mxu1 }
 0x3f9   : > { %v895_v47 = vadd.f32 %v894_v46, %v816_v45 }
 0x3fa   : > { %v896_v48 = vpop.f32.mrf.mxu1 }
 0x3fb   : > { %v2177_v49 = vadd.f32 %v895_v47, %v2145_v25  ;;  %v897_v50 = vadd.f32 %v896_v48, %v816_v45 }
 0x3fc   : > { %v900_v52 = vpop.f32.mrf.mxu1 }
 0x3fd   : > { %v901_v53 = vadd.f32 %v900_v52, %v820_v51  ;;  %909 = vadd.xlane.f32.xlu1 %v2177_v49  ;;  %v2181_v42 = vadd.f32 %v897_v50, %v2137_v23 }
 0x3fe   : > { %v902_v54 = vpop.f32.mrf.mxu1 }
 0x3ff   : > { %v2184_v55 = vadd.f32 %v901_v53, %v2142_v24  ;;  %v903_v56 = vadd.f32 %v902_v54, %v820_v51  ;;  %v955_v54 = vsub.s32 2, %v2157_v58 }
 0x401   : > { %913 = vadd.xlane.f32.xlu1 %v2181_v42  ;;  %911 = vadd.xlane.f32.xlu0 %v2184_v55  ;;  %v2189_v25 = vadd.f32 %v903_v56, %v2134_v22  ;;  %v963_v56 = vsub.s32 3, %v2157_v58  ;;  %v956_v57 = vrot.slane %v2161_v61, %v955_v54 }
 0x405   : > { %915 = vadd.xlane.f32.xlu1 %v2189_v25 }
 0x486   : > { %v910_v23 = vpop.xlane.xlu1 %909 }
 0x487   : > { %v917_v60 = vmul.f32 0.0078125, %v910_v23 }
 0x489   : > { %v2195_v24 = vsub.f32 %v2177_v49, %v917_v60  ;;  %v964_v60 = vrot.slane %v2161_v61, %v963_v56 }
 0x48a   : > { %v912_v62 = vpop.xlane.xlu0 %911  ;;  %v914_v63 = vpop.xlane.xlu1 %913 }
 0x48b   : > { %v918_v0 = vmul.f32 0.0078125, %v912_v62  ;;  %v919_v1 = vmul.f32 0.0078125, %v914_v63  ;;  %v925_v22 = vmul.f32 %v2195_v24, %v2195_v24 }
 0x48d   : > { %v2200_v2 = vsub.f32 %v2184_v55, %v918_v0  ;;  %v2203_v3 = vsub.f32 %v2181_v42, %v919_v1  ;;  %929 = vadd.xlane.f32.xlu1 %v925_v22 }
 0x48e   : > { %v916_v4 = vpop.xlane.xlu1 %915 }
 0x48f   : > { %v920_v5 = vmul.f32 0.0078125, %v916_v4  ;;  %v926_v6 = vmul.f32 %v2200_v2, %v2200_v2  ;;  %v927_v7 = vmul.f32 %v2203_v3, %v2203_v3 }
 0x491   : > { %v2210_v8 = vsub.f32 %v2189_v25, %v920_v5  ;;  %931 = vadd.xlane.f32.xlu1 %v926_v6  ;;  %933 = vadd.xlane.f32.xlu0 %v927_v7 }
 0x493   : > { %v928_v9 = vmul.f32 %v2210_v8, %v2210_v8 }
 0x495   : > { %935 = vadd.xlane.f32.xlu1 %v928_v9 }
 0x516   : > { %v930_v40 = vpop.xlane.xlu1 %929 }
 0x517   : > { %v937_v41 = vmul.f32 0.0078125, %v930_v40 }
 0x519   : > { %v941_v43 = vadd.f32 1e-05, %v937_v41 }
 0x51a   : > { %v934_v44 = vpop.xlane.xlu0 %933  ;;  %v932_v45 = vpop.xlane.xlu1 %931 }
 0x51b   : > { %1686 = vrsqrt.f32 %v941_v43  ;;  %v939_v46 = vmul.f32 0.0078125, %v934_v44  ;;  %v938_v47 = vmul.f32 0.0078125, %v932_v45 }
 0x51d   : > { %v943_v48 = vadd.f32 1e-05, %v939_v46  ;;  %v942_v50 = vadd.f32 1e-05, %v938_v47 }
 0x51e   : > { %v936_v51 = vpop.xlane.xlu1 %935 }
 0x51f   : > { %1688 = vrsqrt.f32 %v943_v48  ;;  %v940_v52 = vmul.f32 0.0078125, %v936_v51 }
 0x520   : > { %1690 = vrsqrt.f32 %v942_v50 }
 0x521   : > { %v944_v53 = vadd.f32 1e-05, %v940_v52 }
 0x523   : > { %1692 = vrsqrt.f32 %v944_v53 }
 0x528   : > { %v1687_v59 = vpop.eup %1686 }
 0x529   : > { %v949_v23 = vmul.f32 %v1687_v59, %v2195_v24 }
 0x52b   : > { %v957_v62 = vmul.f32 %v956_v57, %v949_v23 }
 0x52c   : > { %v1689_v63 = vpop.eup %1688 }
 0x52d   : > { %v1691_v0 = vpop.eup %1690  ;;  %v965_v1 = vadd.f32 %v964_v60, %v957_v62  ;;  %v951_v22 = vmul.f32 %v1689_v63, %v2203_v3  ;;  %v986_v3 = vld [vmem:[%s2085_s29 + $0x8] sm:$0xff] }
 0x52e   : > { %v950_v4 = vmul.f32 %v1691_v0, %v2200_v2  ;;  %v987_v2 = vld [vmem:[%s2085_s29 + $0x10] sm:$0xff]  ;;  %s1214_s29 = sshll.u32 %s2120_s22, 4  ;;  %s2268_s29 = int_to_ptr.vmem [resolvable:$true] %s1214_s29 }
 0x52f   : > { %1514 = vmatprep.mubr.f32.mxu0 %v965_v1  ;;  %v959_v5 = vmul.f32 %v956_v57, %v951_v22  ;;  %1546 = vmatprep.subr.mxu1 %v987_v2  ;;  %s1750_s27 = scalar_lea.vmem %s2268_s29, 512  ;;  %p1757_p9 = scmp.lt.s32.totalorder %s2268_s29, %s1755_s17 }
 0x530   : > { %v1693_v6 = vpop.eup %1692  ;;  %v958_v7 = vmul.f32 %v956_v57, %v950_v4  ;;  %1547 = vmatpush3.msra.mxu1 %v987_v2  ;;  %p1751_p1 = scmp.ne.s32.totalorder %s2268_s29, %s1750_s27  ;;  %p1758_p3 = scmp.lt.s32.totalorder %s1756_s24, %s1750_s27 }
 0x531   : > { %v967_v9 = vadd.f32 %v964_v60, %v959_v5  ;;  %v952_v24 = vmul.f32 %v1693_v6, %v2210_v8  ;;  %1548 = vmatprep.subr.mxu1 %v986_v3  ;;  %v1003_v8 = vsub.s32 4, %v2157_v58 }
 0x532   : > { %v966_v10 = vadd.f32 %v964_v60, %v958_v7  ;;  %1549 = vmatpush3.msra.mxu1 %v986_v3  ;;  %p1752_p6 = pnand %p1751_p1, %p2024_p12  ;;  %p1759_p10 = por %p1758_p3, %p1757_p9 }
 0x533   : > { %v960_v11 = vmul.f32 %v956_v57, %v952_v24  ;;  %1550 = vmatprep.subr.mxu1 %v985_v14  ;;  %v1004_v15 = vrot.slane %v2161_v61, %v1003_v8 }
 0x534   : > { %1515 = vmatmul.mubr.f32.vlgmr.msra.gmra.mxu0 %v966_v10  ;;  %1551 = vmatpush3.msra.mxu1 %v985_v14  ;;  %p1753_p7 = pneg %p1752_p6 }
 0x535   : > { %1517 = vmatprep.mubr.f32.mxu0 %v967_v9  ;;  %v968_v12 = vadd.f32 %v964_v60, %v960_v11 }
 0x536   : > { %p1760_p11 = pnand %p1759_p10, %p1753_p7 }
 0x538   : > { %1518 = vmatmul.mubr.f32.gmra.mxu0 %v968_v12 }
 0x5f4   : > { %v1516_v16 = vpop.f32.mrf.mxu0 }
 0x5f5   : > { %v1077_v17 = vadd.f32 %v1516_v16, %v1004_v15 }
 0x5f6   : > { %v1071_v18 = vpop.f32.mrf.mxu0 }
 0x5f7   : > { %v1072_v19 = vadd.f32 %v1071_v18, %v1004_v15  ;;  %v1095_v20 = vmul.f32 0.2, %v1077_v17  ;;  %vm1091_vm10 = vcmp.ge.f32.partialorder %v1077_v17, 0.0 }
 0x5f8   : > { %v1519_v21 = vpop.f32.mrf.mxu0 }
 0x5f9   : > { %v1094_v26 = vmul.f32 0.2, %v1072_v19  ;;  %v1087_v27 = vadd.f32 %v1519_v21, %v1004_v15  ;;  %vm1090_vm11 = vcmp.ge.f32.partialorder %v1072_v19, 0.0  ;;  %v1099_v31 = vsel %vm1091_vm10, %v1077_v17, %v1095_v20 }
 0x5fa   : > { %v1081_v28 = vpop.f32.mrf.mxu0 }
 0x5fb   : > { %v1082_v29 = vadd.f32 %v1081_v28, %v1004_v15  ;;  %v1098_v30 = vsel %vm1090_vm11, %v1072_v19, %v1094_v26  ;;  %v1097_v32 = vmul.f32 0.2, %v1087_v27  ;;  %vm1093_vm13 = vcmp.ge.f32.partialorder %v1087_v27, 0.0 }
 0x5fc   : > { %1552 = vmatprep.mubr.f32.mxu1 %v1098_v30 }
 0x5fd   : > { %v1096_v33 = vmul.f32 0.2, %v1082_v29  ;;  %1553 = vmatmul.mubr.f32.vlgmr.msra.gmra.mxu1 %v1099_v31  ;;  %vm1092_vm12 = vcmp.ge.f32.partialorder %v1082_v29, 0.0  ;;  %v1101_v35 = vsel %vm1093_vm13, %v1087_v27, %v1097_v32 }
 0x5ff   : > { %v1100_v34 = vsel %vm1092_vm12, %v1082_v29, %v1096_v33 }
 0x600   : > { %1555 = vmatprep.mubr.f32.mxu1 %v1100_v34 }
 0x601   : > { %1556 = vmatmul.mubr.f32.gmra.mxu1 %v1101_v35 }
 0x6bd   : > { %v1554_v38 = vpop.f32.mrf.mxu1 }
 0x6be   : > { %v1178_v39 = vadd.f32 %v1554_v38, %v1105_v37 }
 0x6bf   : > { %v1172_v40 = vpop.f32.mrf.mxu1 }
 0x6c0   : > { %v1192_v41 = vadd.f32 %v1178_v39, %v2184_v55  ;;  %v1173_v43 = vadd.f32 %v1172_v40, %v1105_v37 }
 0x6c1   : > { %v1557_v44 = vpop.f32.mrf.mxu1 }
 0x6c2   : > { %1196 = vst [vmem:[%s2120_s22 + $0x8] sm:$0xff] %v1192_v41  ;;  %v1191_v45 = vadd.f32 %v1173_v43, %v2177_v49  ;;  %v1188_v46 = vadd.f32 %v1557_v44, %v1105_v37 }
 0x6c3   : > { %v1182_v58 = vpop.f32.mrf.mxu1 }
 0x6c4   : > { %1195 = vst [vmem:[%s2120_s22] sm:$0xff] %v1191_v45  ;;  %v1194_v61 = vadd.f32 %v1188_v46, %v2189_v25  ;;  %v1183_v47 = vadd.f32 %v1182_v58, %v1105_v37 }
 0x6c6   : > { %1198 = vst [vmem:[%s2120_s22 + $0x18] sm:$0xff] %v1194_v61  ;;  %v1193_v49 = vadd.f32 %v1183_v47, %v2181_v42 }
 0x6c8   : > { %1197 = vst [vmem:[%s2120_s22 + $0x10] sm:$0xff] %v1193_v49 }
 0x6c9   : > { %1763 = shalt.err (!%p1760_p11)
}
 0x6ca   : > { %s1764_s12 = scalar_lea.hbm %s2266_s26, 512  ;;  %s1768_s25 = scalar_lea.hbm %s2384_s21, 1024 }
 0x6cb   : > { %p1765_p13 = scmp.ne.s32.totalorder %s2266_s26, %s1764_s12  ;;  %p1769_p5 = scmp.lt.s32.totalorder %s2266_s26, %s2384_s21 }
 0x6cc   : > { %p1770_p8 = scmp.lt.s32.totalorder %s1768_s25, %s1764_s12 }
 0x6cd   : > { %p1766_p0 = pnand %p1765_p13, %p2024_p12 }
 0x6ce   : > { %p1771_p1 = por %p1770_p8, %p1769_p5 }
 0x6cf   : > { %p1767_p4 = pneg %p1766_p0 }
 0x6d1   : > { %p1772_p6 = pnand %p1771_p1, %p1767_p4 }
 0x6d3   : > { %1775 = shalt.err (!%p1772_p6)
}
 0x6d4   : > { %s1884_s14 = smov 128   ;;  %s1885_s6 = smov 8  }
 0x6d5   : > { %1564 = dma.vmem_to_hbm [thread:$0]  (%p2024_p12), %s2268_s29, 512, %s2266_s26, %s2275_s28, %s1884_s14, %s1884_s14, %s1885_s6  }
 0x6d6 PF: > { %s2386_s13 = sld [smem:[#allocation11_spill]]  ;;  %p1578_p7 = scmp.ge.s32.totalorder %s1874_s19, 2 }
 0x6d8   : > { %p1574_p9 = pnand %p1578_p7, %p2034_p2 }
 0x6da   : > { %p1575_p3 = pneg %p1574_p9 }
 0x6dc   : > { %s1229_s9 = sand.u32 1, %s2386_s13  }
 0x6dd   : > { %s1230_s23 = scalar_lea.sflag [#allocation4], %s1229_s9 }
 0x6de   : > { %1829 = dma.done.wait (%p1575_p3), %s1230_s23, 512  }
 0x6df   : > { %1831 = vsyncadd (%p1575_p3), %s1230_s23, 4294966784  ;;  %s28_s19 = sadd.s32 1, %s1874_s19   ;;  %s2388_s16 = sld [smem:[#allocation12_spill]] }
 0x6e0   : > { %p25_p10 = scmp.ge.s32.totalorder %s28_s19, 6   ;;  %s2389_s11 = sld [smem:[#allocation20_spill]] }
 0x6e1   : > { %s2390_s12 = sld [smem:[#allocation13_spill]]  ;;  %s2397_s30 = smov %s1838_s10 }
 0x6e2   : > { %s2391_s13 = sld [smem:[#allocation14_spill]] }
 0x6e3   : > { %s2392_s14 = sld [smem:[#allocation19_spill]] }
 0x6e4   : > { %s2393_s15 = sld [smem:[#allocation15_spill]] }
 0x6e5   : > { %s2394_s29 = sld [smem:[#allocation16_spill]]  ;;  %s2398_s10 = smov %s2388_s16 }
 0x6e6   : > { %s2395_s17 = sld [smem:[#allocation17_spill]] }
 0x6e7   : > { %s2396_s18 = sld [smem:[#allocation18_spill]]  ;;  %27 = sbr.rel (!%p25_p10) target bundleno = 15 (0xf), region = 133 }
 0x6eb   : > { %s2399_s16 = smov %s2394_s29 }
 0x6ec   :  { %1235 = vsyncpa [#allocation3], 1 }
 0x6ed   :  { %1237 = vsyncpa [#allocation3 + $0x1], 1 }
 0x6ee   :  { %1238 = vsyncpa [#allocation6], 1 }
 0x6ef   :  { %1240 = vsyncpa [#allocation6 + $0x1], 1 }
 0x6f0   :  { %1241 = vsyncpa [#allocation4], 1 }
 0x6f1   :  { %1243 = vsyncpa [#allocation4 + $0x1], 1 }

</bundles_post_ra>
